<compile_context>
chip_gen: v7x
topology: tpu7x:2x2x1
jax: 0.10.0
libtpu: 0.0.40
codegen_flags: <defaults>
</compile_context>

<pallas_src>
import functools
import numpy as np

import jax
import jax.numpy as jnp
from jax.experimental import pallas as pl
from jax.experimental.pallas import tpu as pltpu

LEAKY_SLOPE = 0.2
BN_EPS = 1e-5
COMPUTE_DTYPE = jnp.bfloat16   # MXU input / activation storage dtype


# ---------------------------------------------------------------------------
# Tiling helpers
# ---------------------------------------------------------------------------
def _round_up(x, m):
    return (x + m - 1) // m * m


def _pick_rows(m, cap=256):
    """Row (sublane) tile and padded row count."""
    if m >= cap:
        return cap, _round_up(m, cap)
    mp = _round_up(max(m, 8), 8)
    return mp, mp


def _pick_lane(n, cap=512):
    """Lane tile for the N axis. Non-128-multiple N uses a full-dim block."""
    if n % 128 != 0:
        return n
    best = 128
    t = 128
    while t <= min(n, cap):
        if n % t == 0:
            best = t
        t += 128
    return best


def _pick_k(k):
    """Reduction tile. Small K stays fully resident (single k-step)."""
    if k <= 2048 or k % 128 != 0:
        return k
    best = 128
    t = 256
    while t <= 1024:
        if k % t == 0:
            best = t
        t += 128
    return best


# ---------------------------------------------------------------------------
# Pallas kernels
# ---------------------------------------------------------------------------
def _make_mm_kernel(activate):
    """out = act(a @ w + bias); bf16 operands, f32 accumulate + epilogue."""
    def kernel(a_ref, w_ref, b_ref, o_ref, acc_ref):
        @pl.when(pl.program_id(2) == 0)
        def _():
            acc_ref[...] = jnp.zeros_like(acc_ref)

        acc_ref[...] += jnp.dot(a_ref[...], w_ref[...],
                                preferred_element_type=jnp.float32)

        @pl.when(pl.program_id(2) == pl.num_programs(2) - 1)
        def _():
            y = acc_ref[...] + b_ref[...]
            if activate:
                y = jnp.where(y > 0, y, LEAKY_SLOPE * y)
            o_ref[...] = y.astype(o_ref.dtype)

    return kernel


_MM_KERNELS = {True: _make_mm_kernel(True), False: _make_mm_kernel(False)}


def _mm_residual_kernel(a_ref, w_ref, s_ref, b_ref, r_ref, o_ref, acc_ref):
    """Bottleneck tail: out = LeakyReLU((a @ w + residual) * bn_scale + bias)."""
    @pl.when(pl.program_id(2) == 0)
    def _():
        acc_ref[...] = jnp.zeros_like(acc_ref)

    acc_ref[...] += jnp.dot(a_ref[...], w_ref[...],
                            preferred_element_type=jnp.float32)

    @pl.when(pl.program_id(2) == pl.num_programs(2) - 1)
    def _():
        y = (acc_ref[...] + r_ref[...].astype(jnp.float32)) * s_ref[...] + b_ref[...]
        y = jnp.where(y > 0, y, LEAKY_SLOPE * y)
        o_ref[...] = y.astype(o_ref.dtype)


def _add_kernel(a_ref, b_ref, o_ref):
    """U-Net skip connection: plain add (f32 math, bf16 storage)."""
    s = a_ref[...].astype(jnp.float32) + b_ref[...].astype(jnp.float32)
    o_ref[...] = s.astype(o_ref.dtype)


# ---------------------------------------------------------------------------
# Pallas wrappers
# ---------------------------------------------------------------------------
@functools.partial(jax.jit, static_argnames=("activate", "out_dtype"))
def fused_matmul(a, w, bias, *, activate, out_dtype=COMPUTE_DTYPE):
    """act(a @ w + bias); a:(M,K) bf16, w:(K,N) bf16 (BN scale pre-folded), bias:(N,) f32."""
    M, K = a.shape
    Kw, N = w.shape
    assert K == Kw, (K, Kw)
    tm, Mp = _pick_rows(M)
    tn = _pick_lane(N)
    tk = _pick_k(K)
    a_p = jnp.pad(a, ((0, Mp - M), (0, 0))) if Mp != M else a
    b2 = bias.reshape(1, N).astype(jnp.float32)
    grid = (Mp // tm, N // tn, K // tk)

    out = pl.pallas_call(
        _MM_KERNELS[activate],
        out_shape=jax.ShapeDtypeStruct((Mp, N), out_dtype),
        grid_spec=pltpu.PrefetchScalarGridSpec(
            num_scalar_prefetch=0,
            grid=grid,
            in_specs=[
                pl.BlockSpec((tm, tk), lambda i, j, k: (i, k)),
                pl.BlockSpec((tk, tn), lambda i, j, k: (k, j)),
                pl.BlockSpec((1, tn), lambda i, j, k: (0, j)),
            ],
            out_specs=pl.BlockSpec((tm, tn), lambda i, j, k: (i, j)),
            scratch_shapes=[pltpu.VMEM((tm, tn), jnp.float32)],
        ),
        compiler_params=pltpu.CompilerParams(
            dimension_semantics=("parallel", "parallel", "arbitrary")
        ),
    )(a_p, w, b2)
    return out if Mp == M else out[:M]


@functools.partial(jax.jit, static_argnames=("out_dtype",))
def fused_matmul_residual(a, w, scale, bias, residual, *, out_dtype=COMPUTE_DTYPE):
    """LeakyReLU((a @ w + residual) * scale + bias) — fused bottleneck tail."""
    M, K = a.shape
    _, N = w.shape
    tm, Mp = _pick_rows(M)
    tn = _pick_lane(N)
    tk = _pick_k(K)
    pad_m = Mp - M
    a_p = jnp.pad(a, ((0, pad_m), (0, 0))) if pad_m else a
    r_p = jnp.pad(residual, ((0, pad_m), (0, 0))) if pad_m else residual
    s2 = scale.reshape(1, N).astype(jnp.float32)
    b2 = bias.reshape(1, N).astype(jnp.float32)
    grid = (Mp // tm, N // tn, K // tk)

    out = pl.pallas_call(
        _mm_residual_kernel,
        out_shape=jax.ShapeDtypeStruct((Mp, N), out_dtype),
        grid_spec=pltpu.PrefetchScalarGridSpec(
            num_scalar_prefetch=0,
            grid=grid,
            in_specs=[
                pl.BlockSpec((tm, tk), lambda i, j, k: (i, k)),
                pl.BlockSpec((tk, tn), lambda i, j, k: (k, j)),
                pl.BlockSpec((1, tn), lambda i, j, k: (0, j)),
                pl.BlockSpec((1, tn), lambda i, j, k: (0, j)),
                pl.BlockSpec((tm, tn), lambda i, j, k: (i, j)),
            ],
            out_specs=pl.BlockSpec((tm, tn), lambda i, j, k: (i, j)),
            scratch_shapes=[pltpu.VMEM((tm, tn), jnp.float32)],
        ),
        compiler_params=pltpu.CompilerParams(
            dimension_semantics=("parallel", "parallel", "arbitrary")
        ),
    )(a_p, w, s2, b2, r_p)
    return out if pad_m == 0 else out[:M]


@jax.jit
def fused_add(a, b):
    """Tiled elementwise add over (M, C) with C on the lane axis."""
    M, C = a.shape
    tm, Mp = _pick_rows(M, cap=512)
    pad = Mp - M
    a_p = jnp.pad(a, ((0, pad), (0, 0))) if pad else a
    b_p = jnp.pad(b, ((0, pad), (0, 0))) if pad else b
    out = pl.pallas_call(
        _add_kernel,
        out_shape=jax.ShapeDtypeStruct((Mp, C), a.dtype),
        grid_spec=pltpu.PrefetchScalarGridSpec(
            num_scalar_prefetch=0,
            grid=(Mp // tm,),
            in_specs=[pl.BlockSpec((tm, C), lambda i: (i, 0)),
                      pl.BlockSpec((tm, C), lambda i: (i, 0))],
            out_specs=pl.BlockSpec((tm, C), lambda i: (i, 0)),
        ),
        compiler_params=pltpu.CompilerParams(dimension_semantics=("parallel",)),
    )(a_p, b_p)
    return out if pad == 0 else out[:M]


# ---------------------------------------------------------------------------
# Conv glue (im2col) — the matmul hot path is the Pallas kernel above
# ---------------------------------------------------------------------------
def im2col(x, kh, kw, stride, pad):
    """Patch matrix with K padded to a multiple of 128 inside the concat (free)."""
    N, H, W, C = x.shape
    xp = jnp.pad(x, ((0, 0), (pad, pad), (pad, pad), (0, 0))) if pad else x
    Ho = (H + 2 * pad - kh) // stride + 1
    Wo = (W + 2 * pad - kw) // stride + 1
    cols = []
    for i in range(kh):
        for j in range(kw):
            cols.append(xp[:, i:i + stride * (Ho - 1) + 1:stride,
                              j:j + stride * (Wo - 1) + 1:stride, :])
    kk = kh * kw * C
    kp = _round_up(kk, 128)
    if kp != kk:
        cols.append(jnp.zeros((N, Ho, Wo, kp - kk), dtype=x.dtype))
    patches = jnp.concatenate(cols, axis=-1)
    return patches.reshape(N * Ho * Wo, kp), (N, Ho, Wo)


def conv_apply(x, p, out_dtype=COMPUTE_DTYPE):
    """Conv2d (+ folded BN + LeakyReLU) via (im2col +) Pallas matmul."""
    k, stride, pad, act = p["k"], p["stride"], p["pad"], p["act"]
    if k == 1 and pad == 0:
        if stride > 1:
            x = x[:, ::stride, ::stride, :]
        N, H, W, C = x.shape
        a, shp = x.reshape(N * H * W, C), (N, H, W)
    else:
        a, shp = im2col(x, k, k, stride, pad)
    y = fused_matmul(a, p["w"], p["bias"], activate=act, out_dtype=out_dtype)
    return y.reshape(shp[0], shp[1], shp[2], -1)


def conv1x1_residual_apply(x, p, residual, bn_scale, bn_bias):
    """Bottleneck conv3 with fused residual add + BN(out) + LeakyReLU."""
    N, H, W, C = x.shape
    a = x.reshape(N * H * W, C)
    r = residual.reshape(N * H * W, -1)
    y = fused_matmul_residual(a, p["w"], bn_scale, bn_bias, r)
    return y.reshape(N, H, W, -1)


def conv_transpose_apply(x, p):
    """ConvTranspose2d(kernel=2, stride=2) as per-pixel matmul + depth-to-space."""
    N, H, W, C = x.shape
    cout = p["cout"]
    y = fused_matmul(x.reshape(N * H * W, C), p["w"], p["bias"], activate=False)
    y = y.reshape(N, H, W, 2, 2, cout)                       # columns are (kh, kw, cout)
    return jnp.transpose(y, (0, 1, 3, 2, 4, 5)).reshape(N, 2 * H, 2 * W, cout)


def skip_add(a, b):
    N, H, W, C = a.shape
    return fused_add(a.reshape(N * H * W, C), b.reshape(N * H * W, C)).reshape(N, H, W, C)


# ---------------------------------------------------------------------------
# Deterministic parameter construction
# ---------------------------------------------------------------------------
class ParamRng:
    def __init__(self, key):
        self.key = key
        self.i = 0

    def normal(self, shape, std):
        self.i += 1
        k = jax.random.fold_in(self.key, self.i)
        return jax.random.normal(k, shape, dtype=jnp.float32) * std


def make_conv(rng, cin, cout, k, stride, pad, with_bn, act):
    w = rng.normal((k, k, cin, cout), std=1.0 / np.sqrt(cin * k * k))
    b = rng.normal((cout,), std=0.01)
    if with_bn:
        # Eval-mode BN (mean=0, var=1, gamma=1, beta=0) folded into weights + bias.
        s = np.float32(1.0 / np.sqrt(1.0 + BN_EPS))
        w = w * s
        b = b * s
    kk = k * k * cin
    w2 = w.reshape(kk, cout)
    if k > 1:                               # match im2col's 128-aligned K padding
        kp = _round_up(kk, 128)
        if kp != kk:
            w2 = jnp.pad(w2, ((0, kp - kk), (0, 0)))
    return {"w": w2.astype(COMPUTE_DTYPE), "bias": b.astype(jnp.float32),
            "k": k, "stride": stride, "pad": pad, "act": act}


def make_bottleneck(rng, cin, cmid, cout, stride=1):
    k2 = 4 if stride == 2 else 3
    p = {
        "conv1": make_conv(rng, cin, cmid, 1, 1, 0, with_bn=True, act=True),
        "conv2": make_conv(rng, cmid, cmid, k2, stride, 1, with_bn=True, act=True),
        "conv3": make_conv(rng, cmid, cout, 1, 1, 0, with_bn=False, act=False),
        "shortcut": None,
    }
    bn_scale = jnp.full((cout,), 1.0 / np.sqrt(1.0 + BN_EPS), dtype=jnp.float32)
    p["bn_scale"] = bn_scale
    p["bn_bias"] = p["conv3"]["bias"] * bn_scale    # conv3 bias folded through bn_out
    if cin != cout or stride != 1:
        p["shortcut"] = make_conv(rng, cin, cout, 1, stride, 0, with_bn=False, act=False)
    return p


def make_conv_transpose(rng, cin, cout):
    w = rng.normal((cin, cout, 2, 2), std=1.0 / np.sqrt(cin))
    b = rng.normal((cout,), std=0.01)
    # Pre-permute columns to (kh, kw, cout) so only a cheap depth-to-space remains.
    w_cols = jnp.transpose(w, (0, 2, 3, 1)).reshape(cin, 4 * cout)
    return {"w": w_cols.astype(COMPUTE_DTYPE),
            "bias": jnp.tile(b, 4).astype(jnp.float32),
            "cout": cout}


def make_backbone_params(seed=0):
    rng = ParamRng(jax.random.PRNGKey(seed))
    P = {}
    P["down128"] = [make_conv(rng, 3, 64, 7, 2, 3, True, True),
                    make_conv(rng, 64, 128, 5, 2, 2, True, True)]
    P["down64"] = [make_bottleneck(rng, 128, 64, 256, 2)] + \
                  [make_bottleneck(rng, 256, 64, 256) for _ in range(2)]
    P["down32"] = [make_bottleneck(rng, 256, 128, 512, 2)] + \
                  [make_bottleneck(rng, 512, 128, 512) for _ in range(3)]
    P["down16"] = [make_bottleneck(rng, 512, 256, 1024, 2)] + \
                  [make_bottleneck(rng, 1024, 256, 1024) for _ in range(5)]
    P["down8"] = [make_bottleneck(rng, 1024, 512, 2048, 2)] + \
                 [make_bottleneck(rng, 2048, 512, 2048) for _ in range(2)]
    P["up16_t"] = make_conv_transpose(rng, 2048, 1024)
    P["up16"] = [make_bottleneck(rng, 1024, 256, 1024) for _ in range(3)]
    P["up32_t"] = make_conv_transpose(rng, 1024, 512)
    P["up32"] = [make_bottleneck(rng, 512, 128, 512) for _ in range(3)]
    P["up64_t"] = make_conv_transpose(rng, 512, 256)
    P["up64"] = [make_bottleneck(rng, 256, 64, 256) for _ in range(3)]
    P["up128_t"] = make_conv_transpose(rng, 256, 128)
    P["up128"] = [make_bottleneck(rng, 128, 32, 128) for _ in range(3)]
    P["out"] = make_conv(rng, 128, 128, 3, 1, 1, True, True)
    return P


# ---------------------------------------------------------------------------
# Forward pass
# ---------------------------------------------------------------------------
def bottleneck_apply(x, p):
    out = conv_apply(x, p["conv1"])
    out = conv_apply(out, p["conv2"])
    residual = conv_apply(x, p["shortcut"]) if p["shortcut"] is not None else x
    # conv3 + residual add + bn_out + LeakyReLU fused into one matmul epilogue.
    return conv1x1_residual_apply(out, p["conv3"], residual, p["bn_scale"], p["bn_bias"])


def seq_bottlenecks(x, plist):
    for p in plist:
        x = bottleneck_apply(x, p)
    return x


def backbone_forward(xs_nchw, P):
    x = jnp.transpose(xs_nchw, (0, 2, 3, 1)).astype(COMPUTE_DTYPE)  # NCHW -> NHWC

    d128 = conv_apply(conv_apply(x, P["down128"][0]), P["down128"][1])
    d64 = seq_bottlenecks(d128, P["down64"])
    d32 = seq_bottlenecks(d64, P["down32"])
    d16 = seq_bottlenecks(d32, P["down16"])
    d8 = seq_bottlenecks(d16, P["down8"])

    u16 = skip_add(seq_bottlenecks(conv_transpose_apply(d8, P["up16_t"]), P["up16"]), d16)
    u32 = skip_add(seq_bottlenecks(conv_transpose_apply(u16, P["up32_t"]), P["up32"]), d32)
    u64 = skip_add(seq_bottlenecks(conv_transpose_apply(u32, P["up64_t"]), P["up64"]), d64)
    u128 = skip_add(seq_bottlenecks(conv_transpose_apply(u64, P["up128_t"]), P["up128"]), d128)

    hs = conv_apply(u128, P["out"], out_dtype=jnp.float32)
    return jnp.transpose(hs, (0, 3, 1, 2))  # NHWC -> NCHW


# ---------------------------------------------------------------------------
if __name__ == "__main__":
    # Input must be divisible by 64 (five stride-2 stages). Small but valid: 64x64.
    key = jax.random.PRNGKey(0)
    xs = jax.random.normal(key, (2, 3, 64, 64), dtype=jnp.float32)

    params = make_backbone_params(seed=0)
    hs = backbone_forward(xs, params)
    hs = jax.block_until_ready(hs)

    assert hs.shape == (2, 128, 16, 16), hs.shape
    assert bool(jnp.all(jnp.isfinite(hs)))
    print("KERNEL_OK")
</pallas_src>

<mosaic_0001>
module attributes {stable_mosaic.version = 11 : i64} {
  func.func @kernel(%arg0: i32, %arg1: i32, %arg2: i32, %arg3: memref<256x256xbf16, #tpu.memory_space<vmem>>, %arg4: memref<256x64xbf16, #tpu.memory_space<vmem>>, %arg5: memref<1x64xf32, #tpu.memory_space<vmem>>, %arg6: memref<256x64xbf16, #tpu.memory_space<vmem>>, %arg7: memref<256x64xf32, #tpu.memory_space<vmem>>) attributes {dimension_semantics = [#tpu.dimension_semantics<parallel>, #tpu.dimension_semantics<parallel>, #tpu.dimension_semantics<arbitrary>], iteration_bounds = array<i64: 8, 1, 1>, scalar_prefetch = 0 : i64, scratch_operands = 1 : i64, tpu.core_type = #tpu.core_type<tc>, window_params = [{transform_indices = @transform_0, window_bounds = array<i64: 256, 256>}, {transform_indices = @transform_1, window_bounds = array<i64: 256, 64>}, {transform_indices = @transform_2, window_bounds = array<i64: 1, 64>}, {transform_indices = @transform_3, window_bounds = array<i64: 256, 64>}]} {
    %c0_i32 = arith.constant 0 : i32
    %0 = arith.cmpi eq, %arg2, %c0_i32 : i32
    %1 = arith.extui %0 : i1 to i32
    %c0_i32_0 = arith.constant 0 : i32
    %2 = arith.cmpi ne, %1, %c0_i32_0 : i32
    scf.if %2 {
      %cst_10 = arith.constant 0.000000e+00 : f32
      %12 = vector.broadcast %cst_10 : f32 to vector<256x64xf32>
      %c0_11 = arith.constant 0 : index
      %c0_12 = arith.constant 0 : index
      %13 = vector.load %arg7[%c0_11, %c0_12] : memref<256x64xf32, #tpu.memory_space<vmem>>, vector<256x64xf32>
      tpu.vector_store %arg7[%c0_11, %c0_12], %12 {strides = array<i32>} : memref<256x64xf32, #tpu.memory_space<vmem>>, vector<256x64xf32>,
    } else {
    }
    %c0 = arith.constant 0 : index
    %c0_1 = arith.constant 0 : index
    %3 = vector.load %arg7[%c0, %c0_1] : memref<256x64xf32, #tpu.memory_space<vmem>>, vector<256x64xf32>
    %c0_2 = arith.constant 0 : index
    %c0_3 = arith.constant 0 : index
    %4 = vector.load %arg3[%c0_2, %c0_3] : memref<256x256xbf16, #tpu.memory_space<vmem>>, vector<256x256xbf16>
    %c0_4 = arith.constant 0 : index
    %c0_5 = arith.constant 0 : index
    %5 = vector.load %arg4[%c0_4, %c0_5] : memref<256x64xbf16, #tpu.memory_space<vmem>>, vector<256x64xbf16>
    %cst = arith.constant dense<0.000000e+00> : vector<256x64xf32>
    %6 = tpu.matmul %4, %5, %cst {dimension_numbers = #tpu.dot_dimension_numbers<[1], [0], [0], [1], [0, 0, 1, 1], [], []>} : vector<256x256xbf16>, vector<256x64xbf16>, vector<256x64xf32> -> vector<256x64xf32>
    %7 = arith.addf %3, %6 : vector<256x64xf32>
    %c0_6 = arith.constant 0 : index
    %c0_7 = arith.constant 0 : index
    %8 = vector.load %arg7[%c0_6, %c0_7] : memref<256x64xf32, #tpu.memory_space<vmem>>, vector<256x64xf32>
    tpu.vector_store %arg7[%c0_6, %c0_7], %7 {strides = array<i32>} : memref<256x64xf32, #tpu.memory_space<vmem>>, vector<256x64xf32>,
    %c0_i32_8 = arith.constant 0 : i32
    %9 = arith.cmpi eq, %arg2, %c0_i32_8 : i32
    %10 = arith.extui %9 : i1 to i32
    %c0_i32_9 = arith.constant 0 : i32
    %11 = arith.cmpi ne, %10, %c0_i32_9 : i32
    scf.if %11 {
      %c0_10 = arith.constant 0 : index
      %c0_11 = arith.constant 0 : index
      %12 = vector.load %arg7[%c0_10, %c0_11] : memref<256x64xf32, #tpu.memory_space<vmem>>, vector<256x64xf32>
      %c0_12 = arith.constant 0 : index
      %c0_13 = arith.constant 0 : index
      %13 = vector.load %arg5[%c0_12, %c0_13] : memref<1x64xf32, #tpu.memory_space<vmem>>, vector<1x64xf32>
      %14 = vector.broadcast %13 : vector<1x64xf32> to vector<256x64xf32>
      %15 = arith.addf %12, %14 : vector<256x64xf32>
      %cst_14 = arith.constant 0.000000e+00 : f32
      %16 = vector.broadcast %cst_14 : f32 to vector<256x64xf32>
      %17 = arith.cmpf ogt, %15, %16 : vector<256x64xf32>
      %cst_15 = arith.constant 2.000000e-01 : f32
      %18 = vector.broadcast %cst_15 : f32 to vector<256x64xf32>
      %19 = arith.mulf %18, %15 : vector<256x64xf32>
      %20 = arith.select %17, %15, %19 : vector<256x64xi1>, vector<256x64xf32>
      %21 = arith.truncf %20 : vector<256x64xf32> to vector<256x64xbf16>
      %c0_16 = arith.constant 0 : index
      %c0_17 = arith.constant 0 : index
      %22 = vector.load %arg6[%c0_16, %c0_17] : memref<256x64xbf16, #tpu.memory_space<vmem>>, vector<256x64xbf16>
      tpu.vector_store %arg6[%c0_16, %c0_17], %21 {strides = array<i32>} : memref<256x64xbf16, #tpu.memory_space<vmem>>, vector<256x64xbf16>,
    } else {
    }
    return
  }
  func.func @transform_0(%arg0: i32, %arg1: i32, %arg2: i32) -> (i32, i32) {
    %c0_i32 = arith.constant 0 : i32
    return %arg0, %arg2 : i32, i32
  }
  func.func @transform_1(%arg0: i32, %arg1: i32, %arg2: i32) -> (i32, i32) {
    %c0_i32 = arith.constant 0 : i32
    return %arg2, %arg1 : i32, i32
  }
  func.func @transform_2(%arg0: i32, %arg1: i32, %arg2: i32) -> (i32, i32) {
    %c0_i32 = arith.constant 0 : i32
    %c0_i32_0 = arith.constant 0 : i32
    return %c0_i32, %arg1 : i32, i32
  }
  func.func @transform_3(%arg0: i32, %arg1: i32, %arg2: i32) -> (i32, i32) {
    %c0_i32 = arith.constant 0 : i32
    return %arg0, %arg1 : i32, i32
  }
}

</mosaic_0001>

<bundles_post_ra>
// kernel: fused_matmul.1
= control target key start
LH: loop header
LB: loop body
LE: loop exit
PB: predicated region body
PF: predicated region fallthrough
CT: control target
= control target key end

     0   :  { %8 = vsyncpa [#allocation4], 0  ;;  %s2210_s0 = inlined_call_operand.hbm [shape: bf16[2048,256], index: 0, kind: input, shape index: {}]   ;;  %s2211_s1 = inlined_call_operand.vmem [shape: bf16[256,64], index: 1, kind: input, shape index: {}]   ;;  %s2212_s2 = inlined_call_operand.vmem [shape: f32[1,64], index: 2, kind: input, shape index: {}]   ;;  %s2213_s3 = inlined_call_operand.vmem [shape: bf16[2048,64], index: 3, kind: output, shape index: {}]  }
   0x1   :  { %10 = vsyncpa [#allocation4 + $0x1], 0  ;;  %s1829_s12 = smov 0   ;;  %s1831_s13 = smov 0  }
   0x2   :  { %s1833_s14 = smov 0   ;;  %s1835_s15 = smov 0  }
   0x3   :  { %s1837_s16 = smov 0   ;;  %s1839_s17 = smov 0  }
   0x4 LB: > { %s1342_s18 = sadd.s32 4294967295, %s1803_s17   ;;  %s35_s19 = sadd.s32 1, %s1799_s16  ;;  %s1803_s17 = sphi %s1839_s17, %s16_s17   ;;  %s1799_s16 = sphi %s1837_s16, %s2221_s16   ;;  %s1795_s15 = sphi %s1835_s15, %s2220_s15   ;;  %s1791_s14 = sphi %s1833_s14, %s2219_s14   ;;  %s1787_s13 = sphi %s1831_s13, %s2218_s13   ;;  %s1783_s12 = sphi %s1829_s12, %s2217_s12  }
   0x5   : > { %p37_p0 = scmp.ge.s32.totalorder %s35_s19, 8  ;;  %s44_s20 = sadd.s32 1, %s1791_s14 }
   0x6   : > { %p51_p1 = scmp.ne.s32.totalorder %s1791_s14, %s1787_s13  ;;  %p52_p2 = scmp.eq.s32.totalorder %s1803_s17, 0 }
   0x7   : > { %s2223_s19 = smov (%p37_p0, %s35_s19), 0  ;;  %p57_p4 = scmp.ne.s32.totalorder %s1787_s13, %s1783_s12 }
   0x8   : > { %p1865_p3 = por %p52_p2, %p51_p1  ;;  %s39_s22 = ssub.s32 %s1799_s16, %s2223_s19 }
   0x9   : > { %p58_p5 = scmp.eq.s32.totalorder %s1342_s18, 0  ;;  %p42_p6 = scmp.eq.s32.totalorder %s39_s22, 0 }
   0xa   : > { %p1607_p8 = scmp.lt.s32.totalorder %s1803_s17, 8  ;;  %s181_s25 = sand.u32 1, %s1791_s14  }
   0xb   : > { %p1872_p7 = por %p58_p5, %p57_p4  ;;  %s1440_s26 = sshll.u32 %s1799_s16, 12 }
   0xc   : > { %s1878_s24 = scalar_select %p42_p6, %s1791_s14, %s44_s20  }
   0xd   : > { %s1348_s27 = sshll.u32 %s181_s25, 8  ;;  %s1885_s30 = scalar_lea.hbm %s2210_s0, %s1440_s26 }
   0xe   : > { %s185_s4 = scalar_lea.vmem [#allocation3], %s1348_s27  ;;  %p1889_p9 = pnand %p1607_p8, %p1865_p3 }
   0xf   : > { %s195_s5 = sshll.u32 %s185_s4, 4  ;;  %s1895_s7 = scalar_lea.sflag [#allocation4], %s181_s25  ;;  %s1893_s5 = int_to_ptr.vmem [resolvable:$true] %s195_s5 }
  0x10   : > { %s1723_s8 = scalar_lea.hbm %s1885_s30, 4096  ;;  %p1725_p11 = pneg %p1889_p9 }
  0x11   : > { %p1724_p10 = scmp.ne.s32.totalorder %s1885_s30, %s1723_s8  ;;  %s1728_s11 = scalar_lea.hbm %s2210_s0, 32768 }
  0x12   : > { %p1729_p0 = scmp.lt.u32.totalorder %s1885_s30, %s2210_s0  ;;  %p1730_p1 = scmp.lt.u32.totalorder %s1728_s11, %s1723_s8 }
  0x13   : > { %p1726_p12 = pnand %p1725_p11, %p1724_p10  ;;  %p1732_p3 = scmp.lt.u32.totalorder %s1723_s8, %s1885_s30 }
  0x14   : > { %p1731_p2 = por %p1730_p1, %p1729_p0 }
  0x15   : > { %p1727_p13 = pneg %p1726_p12 }
  0x16   : > { %p1733_p4 = por %p1732_p3, %p1731_p2 }
  0x18   : > { %p1734_p5 = pnand %p1733_p4, %p1727_p13 }
  0x1a   : > { %1737 = shalt.err (!%p1734_p5)
}
  0x1b   : > { %s1738_s20 = scalar_lea.vmem %s1893_s5, 4096  ;;  %s1805_s21 = smov [#allocation3]  }
  0x1c   : > { %p1739_p6 = scmp.ne.s32.totalorder %s1893_s5, %s1738_s20  ;;  %s1743_s22 = sshll.u32 %s1805_s21, 4  ;;  %s1744_s22 = int_to_ptr.vmem [resolvable:$false] %s1743_s22 }
  0x1d   : > { %s1745_s25 = scalar_lea.vmem %s1744_s22, 8192  ;;  %p1746_p12 = scmp.lt.s32.totalorder %s1893_s5, %s1744_s22 }
  0x1e   : > { %p1741_p8 = pnand %p1739_p6, %p1725_p11  ;;  %p1747_p0 = scmp.lt.s32.totalorder %s1745_s25, %s1738_s20 }
  0x20   : > { %p1742_p10 = pneg %p1741_p8  ;;  %p1748_p1 = por %p1747_p0, %p1746_p12 }
  0x22   : > { %p1749_p2 = pnand %p1748_p1, %p1742_p10 }
  0x24   : > { %1752 = shalt.err (!%p1749_p2)
}
  0x25   : > { %s1806_s26 = smov 128   ;;  %s1807_s27 = smov 8  }
  0x26   : > { %1606 = dma.hbm_to_vmem [thread:$0]  (!%p1889_p9), %s1885_s30, 4096, %s1893_s5, %s1895_s7, %s1806_s26, %s1806_s26, %s1807_s27  }
  0x27   : > { %p1352_p11 = scmp.ge.s32.totalorder %s1803_s17, 1  ;;  %p203_p13 = scmp.lt.s32.totalorder %s1803_s17, 9 }
  0x29   : > { %p204_p3 = pnand %p1352_p11, %p203_p13 }
  0x2a   : > { %s209_s28 = sand.u32 (!%p204_p3), 1, %s1787_s13  }
  0x2b   : > { %207 = sbr.rel (%p204_p3) target bundleno = 381 (0x17d), region = 32  ;;  %s1353_s29 = sshll.u32 (!%p204_p3), %s209_s28, 8 }
  0x2c   : > { %s210_s4 = scalar_lea.sflag (!%p204_p3), [#allocation4], %s209_s28  ;;  %s1926_s8 = scalar_lea.vmem (!%p204_p3), [#allocation3], %s1353_s29 }
  0x32   : > { %1778 = dma.done.wait (%p1872_p7), %s210_s4, 4096  }
  0x33   : > { %1780 = vsyncadd (%p1872_p7), %s210_s4, 4294963200  ;;  %v1659_v0 = vld [vmem:[%s2211_s1 + $0x40] sm:$0xff]   ;;  %v1661_v2 = vld [vmem:[%s2211_s1 + $0x48] sm:$0xff]   ;;  %vm278_vm0 = vcmask 523264   ;;  %v1808_v48 = vmov 0.0   ;;  %vm1187_vm3 = vcmask 519168  }
  0x34   : > { %v1660_v1 = vld [vmem:[%s2211_s1] sm:$0xff]   ;;  %1473 = vmatprep.subr.bf16.mxu0 %v1659_v0  ;;  %1585 = vmatprep.subr.bf16.mxu1 %v1659_v0  ;;  %v1662_v3 = vld [vmem:[%s2211_s1 + $0x8] sm:$0xff]   ;;  %v1663_v4 = vld [vmem:[%s2211_s1 + $0x50] sm:$0xff]   ;;  %279 = vst.msk [vmem:[#allocation2] sm:$0xff] %vm278_vm0, %v1808_v48 }
  0x35   : > { %1474 = vmatpush3.bf16.msra.mxu0 %v1660_v1  ;;  %1593 = vmatpush3.bf16.msra.mxu1 %v1660_v1  ;;  %v1664_v5 = vld [vmem:[%s2211_s1 + $0x10] sm:$0xff]   ;;  %v1665_v6 = vld [vmem:[%s2211_s1 + $0x58] sm:$0xff]   ;;  %v1667_v8 = vld [vmem:[%s2211_s1 + $0x60] sm:$0xff]   ;;  %280 = vst.msk [vmem:[#allocation2 + $0x8] sm:$0xff] %vm278_vm0, %v1808_v48 }
  0x36   : > { %1475 = vmatprep.subr.bf16.mxu0 %v1661_v2  ;;  %1586 = vmatprep.subr.bf16.mxu1 %v1661_v2  ;;  %v1666_v7 = vld [vmem:[%s2211_s1 + $0x18] sm:$0xff]   ;;  %v1668_v9 = vld [vmem:[%s2211_s1 + $0x20] sm:$0xff]   ;;  %v1669_v10 = vld [vmem:[%s2211_s1 + $0x68] sm:$0xff]   ;;  %281 = vst.msk [vmem:[#allocation2 + $0x10] sm:$0xff] %vm278_vm0, %v1808_v48 }
  0x37   : > { %v1677_v11 = vld [vmem:[%s1926_s8 + $0x4] ss:$8 sps:$4 sm:$0xff]   ;;  %v1671_v14 = vld [vmem:[%s2211_s1 + $0x70] sm:$0xff]   ;;  %v1673_v16 = vld [vmem:[%s2211_s1 + $0x78] sm:$0xff]   ;;  %282 = vst.msk [vmem:[#allocation2 + $0x18] sm:$0xff] %vm278_vm0, %v1808_v48 }
  0x38   : > { %v1680_v12 = vld [vmem:[%s1926_s8 + $0x84] ss:$8 sps:$4 sm:$0xff]   ;;  %695 = vmatprep.mubr.bf16.mxu0 %v1677_v11  ;;  %v1672_v15 = vld [vmem:[%s2211_s1 + $0x30] sm:$0xff]   ;;  %v1674_v17 = vld [vmem:[%s2211_s1 + $0x38] sm:$0xff]   ;;  %283 = vst.msk [vmem:[#allocation2 + $0x20] sm:$0xff] %vm278_vm0, %v1808_v48 }
  0x39   : > { %1476 = vmatpush3.bf16.msra.mxu0 %v1662_v3  ;;  %1594 = vmatpush3.bf16.msra.mxu1 %v1662_v3  ;;  %v1670_v13 = vld [vmem:[%s2211_s1 + $0x28] sm:$0xff]   ;;  %v1681_v20 = vld [vmem:[%s1926_s8 + $0x14] ss:$8 sps:$4 sm:$0xff]   ;;  %v1685_v22 = vld [vmem:[%s1926_s8 + $0x10] ss:$8 sps:$4 sm:$0xff]   ;;  %284 = vst.msk [vmem:[#allocation2 + $0x28] sm:$0xff] %vm278_vm0, %v1808_v48 }
  0x3a   : > { %1477 = vmatprep.subr.bf16.mxu0 %v1663_v4  ;;  %1587 = vmatprep.subr.bf16.mxu1 %v1663_v4  ;;  %v1675_v18 = vld [vmem:[%s1926_s8] ss:$8 sps:$4 sm:$0xff]   ;;  %v1683_v21 = vld [vmem:[%s1926_s8 + $0x94] ss:$8 sps:$4 sm:$0xff]   ;;  %v1686_v23 = vld [vmem:[%s1926_s8 + $0x90] ss:$8 sps:$4 sm:$0xff]  }
  0x3b   : > { %759 = vmatprep.mubr.bf16.mxu1 %v1680_v12  ;;  %v1678_v19 = vld [vmem:[%s1926_s8 + $0x80] ss:$8 sps:$4 sm:$0xff]   ;;  %v1687_v24 = vld [vmem:[%s1926_s8 + $0x24] ss:$8 sps:$4 sm:$0xff]   ;;  %v1693_v28 = vld [vmem:[%s1926_s8 + $0x34] ss:$8 sps:$4 sm:$0xff]  }
  0x3c   : > { %v1689_v25 = vld [vmem:[%s1926_s8 + $0xa4] ss:$8 sps:$4 sm:$0xff]   ;;  %v1691_v26 = vld [vmem:[%s1926_s8 + $0x20] ss:$8 sps:$4 sm:$0xff]   ;;  %v1695_v29 = vld [vmem:[%s1926_s8 + $0xb4] ss:$8 sps:$4 sm:$0xff]  }
  0x3d   : > { %1478 = vmatpush3.bf16.msra.mxu0 %v1664_v5  ;;  %1595 = vmatpush3.bf16.msra.mxu1 %v1664_v5  ;;  %v1692_v27 = vld [vmem:[%s1926_s8 + $0xa0] ss:$8 sps:$4 sm:$0xff]   ;;  %v1697_v30 = vld [vmem:[%s1926_s8 + $0x30] ss:$8 sps:$4 sm:$0xff]   ;;  %v1699_v32 = vld [vmem:[%s1926_s8 + $0x44] ss:$8 sps:$4 sm:$0xff]  }
  0x3e   : > { %1479 = vmatprep.subr.bf16.mxu0 %v1665_v6  ;;  %1588 = vmatprep.subr.bf16.mxu1 %v1665_v6  ;;  %v1698_v31 = vld [vmem:[%s1926_s8 + $0xb0] ss:$8 sps:$4 sm:$0xff]   ;;  %v1701_v33 = vld [vmem:[%s1926_s8 + $0xc4] ss:$8 sps:$4 sm:$0xff]   ;;  %v1703_v34 = vld [vmem:[%s1926_s8 + $0x40] ss:$8 sps:$4 sm:$0xff]  }
  0x3f   : > { %v1704_v35 = vld [vmem:[%s1926_s8 + $0xc0] ss:$8 sps:$4 sm:$0xff]   ;;  %v1705_v36 = vld [vmem:[%s1926_s8 + $0x54] ss:$8 sps:$4 sm:$0xff]   ;;  %v1709_v38 = vld [vmem:[%s1926_s8 + $0x50] ss:$8 sps:$4 sm:$0xff]  }
  0x40   : > { %v1707_v37 = vld [vmem:[%s1926_s8 + $0xd4] ss:$8 sps:$4 sm:$0xff]   ;;  %v1710_v39 = vld [vmem:[%s1926_s8 + $0xd0] ss:$8 sps:$4 sm:$0xff]   ;;  %v1711_v40 = vld [vmem:[%s1926_s8 + $0x64] ss:$8 sps:$4 sm:$0xff]  }
  0x41   : > { %1480 = vmatpush3.bf16.msra.mxu0 %v1666_v7  ;;  %1596 = vmatpush3.bf16.msra.mxu1 %v1666_v7  ;;  %v1713_v41 = vld [vmem:[%s1926_s8 + $0xe4] ss:$8 sps:$4 sm:$0xff]   ;;  %v1715_v42 = vld [vmem:[%s1926_s8 + $0x60] ss:$8 sps:$4 sm:$0xff]   ;;  %v1717_v44 = vld [vmem:[%s1926_s8 + $0x74] ss:$8 sps:$4 sm:$0xff]  }
  0x42   : > { %1481 = vmatprep.subr.bf16.mxu0 %v1667_v8  ;;  %1589 = vmatprep.subr.bf16.mxu1 %v1667_v8  ;;  %v1716_v43 = vld [vmem:[%s1926_s8 + $0xe0] ss:$8 sps:$4 sm:$0xff]   ;;  %v1719_v45 = vld [vmem:[%s1926_s8 + $0xf4] ss:$8 sps:$4 sm:$0xff]   ;;  %v1721_v46 = vld [vmem:[%s1926_s8 + $0x70] ss:$8 sps:$4 sm:$0xff]  }
  0x43   : > { %v1722_v47 = vld [vmem:[%s1926_s8 + $0xf0] ss:$8 sps:$4 sm:$0xff]   ;;  %285 = vst.msk [vmem:[#allocation2 + $0x30] sm:$0xff] %vm278_vm0, %v1808_v48  ;;  %286 = vst.msk [vmem:[#allocation2 + $0x38] sm:$0xff] %vm278_vm0, %v1808_v48  ;;  %v311_v51 = vld [vmem:[#allocation2] sm:$0xff]  ;;  %s1354_s8 = sshll.u32 %s1795_s15, 5 }
  0x44   : > { %287 = vst.msk [vmem:[#allocation2 + $0x40] sm:$0xff] %vm278_vm0, %v1808_v48  ;;  %288 = vst.msk [vmem:[#allocation2 + $0x48] sm:$0xff] %vm278_vm0, %v1808_v48  ;;  %v312_v59 = vld [vmem:[#allocation2 + $0x8] sm:$0xff]  ;;  %p265_p7 = scmp.lt.s32.totalorder %s1354_s8, 255  ;;  %v313_v7 = vld [vmem:[#allocation2 + $0x10] sm:$0xff] }
  0x45   : > { %1482 = vmatpush3.bf16.msra.mxu0 %v1668_v9  ;;  %1597 = vmatpush3.bf16.msra.mxu1 %v1668_v9  ;;  %289 = vst.msk [vmem:[#allocation2 + $0x50] sm:$0xff] %vm278_vm0, %v1808_v48  ;;  %290 = vst.msk [vmem:[#allocation2 + $0x58] sm:$0xff] %vm278_vm0, %v1808_v48 }
  0x46   : > { %1483 = vmatprep.subr.bf16.mxu0 %v1669_v10  ;;  %1590 = vmatprep.subr.bf16.mxu1 %v1669_v10  ;;  %291 = vst.msk [vmem:[#allocation2 + $0x60] sm:$0xff] %vm278_vm0, %v1808_v48  ;;  %292 = vst.msk [vmem:[#allocation2 + $0x68] sm:$0xff] %vm278_vm0, %v1808_v48  ;;  %s2225_s8 = smov (!%p265_p7, %s1354_s8), 255 }
  0x47   : > { %293 = vst.msk [vmem:[#allocation2 + $0x70] sm:$0xff] %vm278_vm0, %v1808_v48  ;;  %294 = vst.msk [vmem:[#allocation2 + $0x78] sm:$0xff] %vm278_vm0, %v1808_v48  ;;  %s1355_s26 = sshll.u32 %s2225_s8, 2 }
  0x48   : > { %295 = vst.msk [vmem:[#allocation2 + $0x80] sm:$0xff] %vm278_vm0, %v1808_v48  ;;  %296 = vst.msk [vmem:[#allocation2 + $0x88] sm:$0xff] %vm278_vm0, %v1808_v48  ;;  %s2068_s29 = scalar_lea.vmem %s2213_s3, %s1355_s26 }
  0x49   : > { %1484 = vmatpush3.bf16.msra.mxu0 %v1670_v13  ;;  %1598 = vmatpush3.bf16.msra.mxu1 %v1670_v13  ;;  %297 = vst.msk [vmem:[#allocation2 + $0x90] sm:$0xff] %vm278_vm0, %v1808_v48  ;;  %298 = vst.msk [vmem:[#allocation2 + $0x98] sm:$0xff] %vm278_vm0, %v1808_v48 }
  0x4a   : > { %1485 = vmatprep.subr.bf16.mxu0 %v1671_v14  ;;  %1591 = vmatprep.subr.bf16.mxu1 %v1671_v14  ;;  %299 = vst.msk [vmem:[#allocation2 + $0xa0] sm:$0xff] %vm278_vm0, %v1808_v48  ;;  %300 = vst.msk [vmem:[#allocation2 + $0xa8] sm:$0xff] %vm278_vm0, %v1808_v48 }
  0x4b   : > { %301 = vst.msk [vmem:[#allocation2 + $0xb0] sm:$0xff] %vm278_vm0, %v1808_v48  ;;  %302 = vst.msk [vmem:[#allocation2 + $0xb8] sm:$0xff] %vm278_vm0, %v1808_v48 }
  0x4c   : > { %303 = vst.msk [vmem:[#allocation2 + $0xc0] sm:$0xff] %vm278_vm0, %v1808_v48  ;;  %304 = vst.msk [vmem:[#allocation2 + $0xc8] sm:$0xff] %vm278_vm0, %v1808_v48 }
  0x4d   : > { %1486 = vmatpush3.bf16.msra.mxu0 %v1672_v15  ;;  %1599 = vmatpush3.bf16.msra.mxu1 %v1672_v15  ;;  %305 = vst.msk [vmem:[#allocation2 + $0xd0] sm:$0xff] %vm278_vm0, %v1808_v48  ;;  %306 = vst.msk [vmem:[#allocation2 + $0xd8] sm:$0xff] %vm278_vm0, %v1808_v48  ;;  %v2054_v15 = vld [vmem:[%s2212_s2] ss:$0 sm:$0xff] }
  0x4e   : > { %1487 = vmatprep.subr.bf16.mxu0 %v1673_v16  ;;  %1592 = vmatprep.subr.bf16.mxu1 %v1673_v16  ;;  %307 = vst.msk [vmem:[#allocation2 + $0xe0] sm:$0xff] %vm278_vm0, %v1808_v48  ;;  %308 = vst.msk [vmem:[#allocation2 + $0xe8] sm:$0xff] %vm278_vm0, %v1808_v48  ;;  %v314_v16 = vld [vmem:[#allocation2 + $0x18] sm:$0xff] }
  0x4f   : > { %309 = vst.msk [vmem:[#allocation2 + $0xf0] sm:$0xff] %vm278_vm0, %v1808_v48  ;;  %310 = vst.msk [vmem:[#allocation2 + $0xf8] sm:$0xff] %vm278_vm0, %v1808_v48  ;;  %v327_v53 = vld [vmem:[#allocation2 + $0x80] sm:$0xff]  ;;  %v328_v61 = vld [vmem:[#allocation2 + $0x88] sm:$0xff] }
  0x50   : > { %v329_v9 = vld [vmem:[#allocation2 + $0x90] sm:$0xff] }
  0x51   : > { %1488 = vmatpush3.bf16.msra.mxu0 %v1674_v17  ;;  %1600 = vmatpush3.bf16.msra.mxu1 %v1674_v17 }
  0x54   : > { %696 = vmatmul.mubr.bf16.vlgmr.msra.gmra.mrb[0].mxu0 %v1675_v18  ;;  %760 = vmatmul.mubr.bf16.vlgmr.msra.gmra.mrb[0].mxu1 %v1678_v19  ;;  %v330_v18 = vld [vmem:[#allocation2 + $0x98] sm:$0xff] }
  0x55   : > { %703 = vmatprep.mubr.bf16.mxu0 %v1681_v20  ;;  %767 = vmatprep.mubr.bf16.mxu1 %v1683_v21 }
  0x5c   : > { %704 = vmatmul.mubr.bf16.gmra.mrb[4].mxu0 %v1685_v22  ;;  %768 = vmatmul.mubr.bf16.gmra.mrb[4].mxu1 %v1686_v23 }
  0x5d   : > { %711 = vmatprep.mubr.bf16.mxu0 %v1687_v24  ;;  %775 = vmatprep.mubr.bf16.mxu1 %v1689_v25 }
  0x64   : > { %712 = vmatmul.mubr.bf16.gmra.mrb[8].mxu0 %v1691_v26  ;;  %776 = vmatmul.mubr.bf16.gmra.mrb[8].mxu1 %v1692_v27 }
  0x65   : > { %719 = vmatprep.mubr.bf16.mxu0 %v1693_v28  ;;  %783 = vmatprep.mubr.bf16.mxu1 %v1695_v29 }
  0x6c   : > { %720 = vmatmul.mubr.bf16.gmra.mrb[12].mxu0 %v1697_v30  ;;  %784 = vmatmul.mubr.bf16.gmra.mrb[12].mxu1 %v1698_v31 }
  0x6d   : > { %727 = vmatprep.mubr.bf16.mxu0 %v1699_v32  ;;  %791 = vmatprep.mubr.bf16.mxu1 %v1701_v33 }
  0x74   : > { %728 = vmatmul.mubr.bf16.gmra.mrb[16].mxu0 %v1703_v34  ;;  %792 = vmatmul.mubr.bf16.gmra.mrb[16].mxu1 %v1704_v35 }
  0x75   : > { %735 = vmatprep.mubr.bf16.mxu0 %v1705_v36  ;;  %799 = vmatprep.mubr.bf16.mxu1 %v1707_v37 }
  0x7c   : > { %736 = vmatmul.mubr.bf16.gmra.mrb[20].mxu0 %v1709_v38  ;;  %800 = vmatmul.mubr.bf16.gmra.mrb[20].mxu1 %v1710_v39 }
  0x7d   : > { %743 = vmatprep.mubr.bf16.mxu0 %v1711_v40  ;;  %807 = vmatprep.mubr.bf16.mxu1 %v1713_v41  ;;  %v315_v40 = vld [vmem:[#allocation2 + $0x20] sm:$0xff] }
  0x84   : > { %744 = vmatmul.mubr.bf16.gmra.mrb[24].mxu0 %v1715_v42  ;;  %808 = vmatmul.mubr.bf16.gmra.mrb[24].mxu1 %v1716_v43 }
  0x85   : > { %751 = vmatprep.mubr.bf16.mxu0 %v1717_v44  ;;  %815 = vmatprep.mubr.bf16.mxu1 %v1719_v45 }
  0x8c   : > { %752 = vmatmul.mubr.bf16.gmra.mrb[28].mxu0 %v1721_v46  ;;  %816 = vmatmul.mubr.bf16.gmra.mrb[28].mxu1 %v1722_v47  ;;  %v331_v46 = vld [vmem:[#allocation2 + $0xa0] sm:$0xff] }
 0x127   : > { %v1489_v49 = vpop.f32.mrb[0].mxu0  ;;  %v1537_v50 = vpop.f32.mrb[0].mxu1 }
 0x128   : > { %v1490_v52 = vpop.f32.mrb[1].mxu0  ;;  %v1538_v54 = vpop.f32.mrb[1].mxu1 }
 0x129   : > { %v1491_v55 = vadd.f32 %v1490_v52, %v1489_v49  ;;  %v1539_v56 = vadd.f32 %v1538_v54, %v1537_v50  ;;  %v1492_v57 = vpop.f32.mrb[2].mxu0  ;;  %v1540_v58 = vpop.f32.mrb[2].mxu1  ;;  %v316_v52 = vld [vmem:[#allocation2 + $0x28] sm:$0xff] }
 0x12a   : > { %v1493_v60 = vpop.f32.mrb[3].mxu0  ;;  %v1541_v62 = vpop.f32.mrb[3].mxu1 }
 0x12b   : > { %v824_v63 = vadd.f32 %v1491_v55, %v311_v51  ;;  %v840_v0 = vadd.f32 %v1539_v56, %v327_v53  ;;  %v1494_v1 = vadd.f32 %v1493_v60, %v1492_v57  ;;  %v1542_v2 = vadd.f32 %v1541_v62, %v1540_v58 }
 0x12d   : > { %857 = vst.msk [vmem:[#allocation2] sm:$0xff] %vm278_vm0, %v824_v63  ;;  %873 = vst.msk [vmem:[#allocation2 + $0x80] sm:$0xff] %vm278_vm0, %v840_v0  ;;  %v825_v3 = vadd.f32 %v1494_v1, %v312_v59  ;;  %v841_v4 = vadd.f32 %v1542_v2, %v328_v61  ;;  %v332_v0 = vld [vmem:[#allocation2 + $0xa8] sm:$0xff] }
 0x12f   : > { %858 = vst.msk [vmem:[#allocation2 + $0x8] sm:$0xff] %vm278_vm0, %v825_v3  ;;  %874 = vst.msk [vmem:[#allocation2 + $0x88] sm:$0xff] %vm278_vm0, %v841_v4  ;;  %v1495_v5 = vpop.f32.mrb[4].mxu0  ;;  %v1543_v6 = vpop.f32.mrb[4].mxu1 }
 0x130   : > { %v1496_v8 = vpop.f32.mrb[5].mxu0  ;;  %v1544_v10 = vpop.f32.mrb[5].mxu1 }
 0x131   : > { %v1497_v11 = vadd.f32 %v1496_v8, %v1495_v5  ;;  %v1545_v12 = vadd.f32 %v1544_v10, %v1543_v6  ;;  %v1498_v13 = vpop.f32.mrb[6].mxu0  ;;  %v1546_v14 = vpop.f32.mrb[6].mxu1 }
 0x132   : > { %v1499_v17 = vpop.f32.mrb[7].mxu0  ;;  %v1547_v19 = vpop.f32.mrb[7].mxu1 }
 0x133   : > { %v826_v20 = vadd.f32 %v1497_v11, %v313_v7  ;;  %v842_v21 = vadd.f32 %v1545_v12, %v329_v9  ;;  %v1500_v22 = vadd.f32 %v1499_v17, %v1498_v13  ;;  %v1548_v23 = vadd.f32 %v1547_v19, %v1546_v14  ;;  %v317_v17 = vld [vmem:[#allocation2 + $0x30] sm:$0xff] }
 0x134   : > { %v892_v24 = vld [vmem:[#allocation2] sm:$0xff]  ;;  %v333_v19 = vld [vmem:[#allocation2 + $0xb0] sm:$0xff] }
 0x135   : > { %v908_v25 = vld [vmem:[#allocation2 + $0x80] sm:$0xff]  ;;  %v931_v26 = vadd.f32 %v2054_v15, %v892_v24  ;;  %859 = vst.msk [vmem:[#allocation2 + $0x10] sm:$0xff] %vm278_vm0, %v826_v20  ;;  %875 = vst.msk [vmem:[#allocation2 + $0x90] sm:$0xff] %vm278_vm0, %v842_v21  ;;  %v827_v28 = vadd.f32 %v1500_v22, %v314_v16  ;;  %v843_v29 = vadd.f32 %v1548_v23, %v330_v18 }
 0x136   : > { %v947_v27 = vadd.f32 %v2054_v15, %v908_v25  ;;  %v893_v30 = vld [vmem:[#allocation2 + $0x8] sm:$0xff] }
 0x137   : > { %v909_v31 = vld [vmem:[#allocation2 + $0x88] sm:$0xff]  ;;  %vm963_vm1 = vcmp.gt.f32.partialorder %v931_v26, 0.0  ;;  %v995_v32 = vmul.f32 0.2, %v931_v26  ;;  %860 = vst.msk [vmem:[#allocation2 + $0x18] sm:$0xff] %vm278_vm0, %v827_v28  ;;  %876 = vst.msk [vmem:[#allocation2 + $0x98] sm:$0xff] %vm278_vm0, %v843_v29  ;;  %v932_v34 = vadd.f32 %v2054_v15, %v893_v30 }
 0x138   : > { %vm979_vm2 = vcmp.gt.f32.partialorder %v947_v27, 0.0  ;;  %v1011_v33 = vmul.f32 0.2, %v947_v27  ;;  %v948_v35 = vadd.f32 %v2054_v15, %v909_v31  ;;  %v1501_v36 = vpop.f32.mrb[8].mxu0  ;;  %v1549_v37 = vpop.f32.mrb[8].mxu1  ;;  %v334_v31 = vld [vmem:[#allocation2 + $0xb8] sm:$0xff] }
 0x139   : > { %v1027_v38 = vsel %vm963_vm1, %v931_v26, %v995_v32  ;;  %v1502_v41 = vpop.f32.mrb[9].mxu0  ;;  %v1550_v42 = vpop.f32.mrb[9].mxu1  ;;  %vm964_vm4 = vcmp.gt.f32.partialorder %v932_v34, 0.0  ;;  %v996_v45 = vmul.f32 0.2, %v932_v34  ;;  %v318_v26 = vld [vmem:[#allocation2 + $0x38] sm:$0xff] }
 0x13a   : > { %v1043_v39 = vsel %vm979_vm2, %v947_v27, %v1011_v33  ;;  %v1441_v43 = vpack.c.bf16 %v1027_v38, %v1027_v38  ;;  %v1504_v47 = vpop.f32.mrb[10].mxu0  ;;  %v1552_v48 = vpop.f32.mrb[10].mxu1  ;;  %vm980_vm5 = vcmp.gt.f32.partialorder %v948_v35, 0.0  ;;  %v1012_v49 = vmul.f32 0.2, %v948_v35 }
 0x13b   : > { %v1457_v44 = vpack.c.bf16 %v1043_v39, %v1043_v39  ;;  %v1503_v50 = vadd.f32 %v1502_v41, %v1501_v36  ;;  %v1551_v51 = vadd.f32 %v1550_v42, %v1549_v37  ;;  %v1505_v53 = vpop.f32.mrb[11].mxu0  ;;  %v1553_v54 = vpop.f32.mrb[11].mxu1  ;;  %v1028_v55 = vsel %vm964_vm4, %v932_v34, %v996_v45 }
 0x13c   : > { %1188 = vst.msk [vmem:[%s2068_s29] sm:$0xf] %vm1187_vm3, %v1441_v43  ;;  %v894_v56 = vld [vmem:[#allocation2 + $0x10] sm:$0xff]  ;;  %v1506_v58 = vadd.f32 %v1505_v53, %v1504_v47  ;;  %v1554_v59 = vadd.f32 %v1553_v54, %v1552_v48  ;;  %v1442_v60 = vpack.c.bf16 %v1028_v55, %v1028_v55  ;;  %v1044_v61 = vsel %vm980_vm5, %v948_v35, %v1012_v49 }
 0x13d   : > { %1204 = vst.msk [vmem:[%s2068_s29 + $0x40] sm:$0xf] %vm1187_vm3, %v1457_v44  ;;  %v910_v57 = vld [vmem:[#allocation2 + $0x90] sm:$0xff]  ;;  %v933_v62 = vadd.f32 %v2054_v15, %v894_v56  ;;  %v1458_v1 = vpack.c.bf16 %v1044_v61, %v1044_v61  ;;  %v828_v4 = vadd.f32 %v1503_v50, %v315_v40  ;;  %v844_v5 = vadd.f32 %v1551_v51, %v331_v46  ;;  %v319_v51 = vld [vmem:[#allocation2 + $0x40] sm:$0xff] }
 0x13e   : > { %v949_v63 = vadd.f32 %v2054_v15, %v910_v57  ;;  %v895_v2 = vld [vmem:[#allocation2 + $0x18] sm:$0xff]  ;;  %v829_v6 = vadd.f32 %v1506_v58, %v316_v52  ;;  %1189 = vst.msk [vmem:[%s2068_s29 + $0x4] sm:$0xf] %vm1187_vm3, %v1442_v60  ;;  %v845_v11 = vadd.f32 %v1554_v59, %v332_v0  ;;  %v335_v56 = vld [vmem:[#allocation2 + $0xc0] sm:$0xff] }
 0x13f   : > { %v911_v3 = vld [vmem:[#allocation2 + $0x98] sm:$0xff]  ;;  %vm965_vm6 = vcmp.gt.f32.partialorder %v933_v62, 0.0  ;;  %v997_v7 = vmul.f32 0.2, %v933_v62  ;;  %1205 = vst.msk [vmem:[%s2068_s29 + $0x44] sm:$0xf] %vm1187_vm3, %v1458_v1  ;;  %v934_v9 = vadd.f32 %v2054_v15, %v895_v2 }
 0x140   : > { %vm981_vm7 = vcmp.gt.f32.partialorder %v949_v63, 0.0  ;;  %v1013_v8 = vmul.f32 0.2, %v949_v63  ;;  %v950_v10 = vadd.f32 %v2054_v15, %v911_v3  ;;  %861 = vst.msk [vmem:[#allocation2 + $0x20] sm:$0xff] %vm278_vm0, %v828_v4  ;;  %877 = vst.msk [vmem:[#allocation2 + $0xa0] sm:$0xff] %vm278_vm0, %v844_v5  ;;  %v1507_v12 = vpop.f32.mrb[12].mxu0 }
 0x141   : > { %862 = vst.msk [vmem:[#allocation2 + $0x28] sm:$0xff] %vm278_vm0, %v829_v6  ;;  %v1555_v13 = vpop.f32.mrb[12].mxu1  ;;  %v1029_v14 = vsel %vm965_vm6, %v933_v62, %v997_v7  ;;  %v1508_v18 = vpop.f32.mrb[13].mxu0  ;;  %vm966_vm8 = vcmp.gt.f32.partialorder %v934_v9, 0.0  ;;  %v998_v23 = vmul.f32 0.2, %v934_v9 }
 0x142   : > { %v1045_v16 = vsel %vm981_vm7, %v949_v63, %v1013_v8  ;;  %v1556_v20 = vpop.f32.mrb[13].mxu1  ;;  %v1443_v21 = vpack.c.bf16 %v1029_v14, %v1029_v14  ;;  %878 = vst.msk [vmem:[#allocation2 + $0xa8] sm:$0xff] %vm278_vm0, %v845_v11  ;;  %v1510_v24 = vpop.f32.mrb[14].mxu0  ;;  %vm982_vm9 = vcmp.gt.f32.partialorder %v950_v10, 0.0  ;;  %v1014_v27 = vmul.f32 0.2, %v950_v10 }
 0x143   : > { %v1459_v22 = vpack.c.bf16 %v1045_v16, %v1045_v16  ;;  %v1558_v25 = vpop.f32.mrb[14].mxu1  ;;  %v1509_v28 = vadd.f32 %v1508_v18, %v1507_v12  ;;  %v1557_v29 = vadd.f32 %v1556_v20, %v1555_v13  ;;  %v1511_v30 = vpop.f32.mrb[15].mxu0  ;;  %v1030_v33 = vsel %vm966_vm8, %v934_v9, %v998_v23  ;;  %v320_v1 = vld [vmem:[#allocation2 + $0x48] sm:$0xff] }
 0x144   : > { %v1559_v32 = vpop.f32.mrb[15].mxu1  ;;  %1190 = vst.msk [vmem:[%s2068_s29 + $0x8] sm:$0xf] %vm1187_vm3, %v1443_v21  ;;  %v1512_v34 = vadd.f32 %v1511_v30, %v1510_v24  ;;  %v1444_v36 = vpack.c.bf16 %v1030_v33, %v1030_v33  ;;  %v1046_v37 = vsel %vm982_vm9, %v950_v10, %v1014_v27  ;;  %v336_v11 = vld [vmem:[#allocation2 + $0xc8] sm:$0xff] }
 0x145   : > { %1206 = vst.msk [vmem:[%s2068_s29 + $0x48] sm:$0xf] %vm1187_vm3, %v1459_v22  ;;  %v1560_v35 = vadd.f32 %v1559_v32, %v1558_v25  ;;  %v830_v38 = vadd.f32 %v1509_v28, %v317_v17  ;;  %v846_v39 = vadd.f32 %v1557_v29, %v333_v19  ;;  %v1460_v40 = vpack.c.bf16 %v1046_v37, %v1046_v37 }
 0x146   : > { %v831_v41 = vadd.f32 %v1512_v34, %v318_v26  ;;  %1191 = vst.msk [vmem:[%s2068_s29 + $0xc] sm:$0xf] %vm1187_vm3, %v1444_v36 }
 0x147   : > { %v847_v42 = vadd.f32 %v1560_v35, %v334_v31  ;;  %v896_v43 = vld [vmem:[#allocation2 + $0x20] sm:$0xff]  ;;  %863 = vst.msk [vmem:[#allocation2 + $0x30] sm:$0xff] %vm278_vm0, %v830_v38  ;;  %879 = vst.msk [vmem:[#allocation2 + $0xb0] sm:$0xff] %vm278_vm0, %v846_v39  ;;  %v1513_v46 = vpop.f32.mrb[16].mxu0  ;;  %v1561_v47 = vpop.f32.mrb[16].mxu1  ;;  %v321_v39 = vld [vmem:[#allocation2 + $0x50] sm:$0xff] }
 0x148   : > { %v912_v44 = vld [vmem:[#allocation2 + $0xa0] sm:$0xff]  ;;  %v897_v45 = vld [vmem:[#allocation2 + $0x28] sm:$0xff]  ;;  %1207 = vst.msk [vmem:[%s2068_s29 + $0x4c] sm:$0xf] %vm1187_vm3, %v1460_v40  ;;  %v935_v48 = vadd.f32 %v2054_v15, %v896_v43  ;;  %v1514_v52 = vpop.f32.mrb[17].mxu0  ;;  %v1562_v53 = vpop.f32.mrb[17].mxu1 }
 0x149   : > { %v951_v49 = vadd.f32 %v2054_v15, %v912_v44  ;;  %v936_v50 = vadd.f32 %v2054_v15, %v897_v45  ;;  %864 = vst.msk [vmem:[#allocation2 + $0x38] sm:$0xff] %vm278_vm0, %v831_v41  ;;  %880 = vst.msk [vmem:[#allocation2 + $0xb8] sm:$0xff] %vm278_vm0, %v847_v42  ;;  %v913_v54 = vld [vmem:[#allocation2 + $0xa8] sm:$0xff]  ;;  %v1515_v55 = vadd.f32 %v1514_v52, %v1513_v46  ;;  %v1516_v58 = vpop.f32.mrb[18].mxu0  ;;  %v1564_v59 = vpop.f32.mrb[18].mxu1  ;;  %v337_v41 = vld [vmem:[#allocation2 + $0xd0] sm:$0xff] }
 0x14a   : > { %v1563_v57 = vadd.f32 %v1562_v53, %v1561_v47  ;;  %vm967_vm10 = vcmp.gt.f32.partialorder %v935_v48, 0.0  ;;  %v999_v60 = vmul.f32 0.2, %v935_v48  ;;  %v952_v63 = vadd.f32 %v2054_v15, %v913_v54  ;;  %v1517_v2 = vpop.f32.mrb[19].mxu0  ;;  %v1565_v3 = vpop.f32.mrb[19].mxu1 }
 0x14b   : > { %vm983_vm11 = vcmp.gt.f32.partialorder %v951_v49, 0.0  ;;  %v1015_v61 = vmul.f32 0.2, %v951_v49  ;;  %vm968_vm12 = vcmp.gt.f32.partialorder %v936_v50, 0.0  ;;  %v1000_v62 = vmul.f32 0.2, %v936_v50 }
 0x14c   : > { %v832_v0 = vadd.f32 %v1515_v55, %v319_v51  ;;  %v1031_v4 = vsel %vm967_vm10, %v935_v48, %v999_v60  ;;  %v848_v6 = vadd.f32 %v1563_v57, %v335_v56  ;;  %v1518_v7 = vadd.f32 %v1517_v2, %v1516_v58  ;;  %v338_v60 = vld [vmem:[#allocation2 + $0xd8] sm:$0xff] }
 0x14d   : > { %v1047_v5 = vsel %vm983_vm11, %v951_v49, %v1015_v61  ;;  %v1445_v8 = vpack.c.bf16 %v1031_v4, %v1031_v4  ;;  %v1032_v10 = vsel %vm968_vm12, %v936_v50, %v1000_v62  ;;  %vm984_vm13 = vcmp.gt.f32.partialorder %v952_v63, 0.0  ;;  %v322_v49 = vld [vmem:[#allocation2 + $0x58] sm:$0xff]  ;;  %v323_v61 = vld [vmem:[#allocation2 + $0x60] sm:$0xff] }
 0x14e   : > { %v1461_v9 = vpack.c.bf16 %v1047_v5, %v1047_v5  ;;  %865 = vst.msk [vmem:[#allocation2 + $0x40] sm:$0xff] %vm278_vm0, %v832_v0  ;;  %v1446_v12 = vpack.c.bf16 %v1032_v10, %v1032_v10  ;;  %v1016_v13 = vmul.f32 0.2, %v952_v63  ;;  %v898_v14 = vld [vmem:[#allocation2 + $0x30] sm:$0xff]  ;;  %881 = vst.msk [vmem:[#allocation2 + $0xc0] sm:$0xff] %vm278_vm0, %v848_v6  ;;  %v833_v17 = vadd.f32 %v1518_v7, %v320_v1  ;;  %v339_v7 = vld [vmem:[#allocation2 + $0xe0] sm:$0xff] }
 0x14f   : > { %v914_v16 = vld [vmem:[#allocation2 + $0xb0] sm:$0xff]  ;;  %v1566_v18 = vadd.f32 %v1565_v3, %v1564_v59  ;;  %1192 = vst.msk [vmem:[%s2068_s29 + $0x10] sm:$0xf] %vm1187_vm3, %v1445_v8  ;;  %v937_v19 = vadd.f32 %v2054_v15, %v898_v14  ;;  %v1519_v23 = vpop.f32.mrb[20].mxu0  ;;  %v1567_v24 = vpop.f32.mrb[20].mxu1 }
 0x150   : > { %1208 = vst.msk [vmem:[%s2068_s29 + $0x50] sm:$0xf] %vm1187_vm3, %v1461_v9  ;;  %v953_v20 = vadd.f32 %v2054_v15, %v914_v16  ;;  %v899_v21 = vld [vmem:[#allocation2 + $0x38] sm:$0xff]  ;;  %1193 = vst.msk [vmem:[%s2068_s29 + $0x14] sm:$0xf] %vm1187_vm3, %v1446_v12  ;;  %v1048_v25 = vsel %vm984_vm13, %v952_v63, %v1016_v13  ;;  %v1520_v29 = vpop.f32.mrb[21].mxu0 }
 0x151   : > { %v915_v22 = vld [vmem:[#allocation2 + $0xb8] sm:$0xff]  ;;  %v938_v26 = vadd.f32 %v2054_v15, %v899_v21  ;;  %866 = vst.msk [vmem:[#allocation2 + $0x48] sm:$0xff] %vm278_vm0, %v833_v17  ;;  %v849_v28 = vadd.f32 %v1566_v18, %v336_v11  ;;  %v1568_v30 = vpop.f32.mrb[21].mxu1  ;;  %v1462_v31 = vpack.c.bf16 %v1048_v25, %v1048_v25  ;;  %vm969_vm14 = vcmp.gt.f32.partialorder %v937_v19, 0.0  ;;  %v1522_v33 = vpop.f32.mrb[22].mxu0 }
 0x152   : > { %v954_v27 = vadd.f32 %v2054_v15, %v915_v22  ;;  %v1001_v32 = vmul.f32 0.2, %v937_v19  ;;  %vm985_vm15 = vcmp.gt.f32.partialorder %v953_v20, 0.0  ;;  %v1570_v34 = vpop.f32.mrb[22].mxu1  ;;  %v1017_v35 = vmul.f32 0.2, %v953_v20 }
 0x153   : > { %vm970_vm1 = vcmp.gt.f32.partialorder %v938_v26, 0.0  ;;  %v1002_v36 = vmul.f32 0.2, %v938_v26  ;;  %882 = vst.msk [vmem:[#allocation2 + $0xc8] sm:$0xff] %vm278_vm0, %v849_v28  ;;  %v1521_v40 = vadd.f32 %v1520_v29, %v1519_v23  ;;  %v1569_v42 = vadd.f32 %v1568_v30, %v1567_v24  ;;  %v1523_v43 = vpop.f32.mrb[23].mxu0  ;;  %v1571_v44 = vpop.f32.mrb[23].mxu1 }
 0x154   : > { %vm986_vm2 = vcmp.gt.f32.partialorder %v954_v27, 0.0  ;;  %1209 = vst.msk [vmem:[%s2068_s29 + $0x54] sm:$0xf] %vm1187_vm3, %v1462_v31  ;;  %v1033_v37 = vsel %vm969_vm14, %v937_v19, %v1001_v32  ;;  %v1018_v38 = vmul.f32 0.2, %v954_v27  ;;  %v1049_v46 = vsel %vm985_vm15, %v953_v20, %v1017_v35 }
 0x155   : > { %v1447_v45 = vpack.c.bf16 %v1033_v37, %v1033_v37  ;;  %v1034_v47 = vsel %vm970_vm1, %v938_v26, %v1002_v36  ;;  %v900_v48 = vld [vmem:[#allocation2 + $0x40] sm:$0xff]  ;;  %v1524_v50 = vadd.f32 %v1523_v43, %v1522_v33  ;;  %v1463_v51 = vpack.c.bf16 %v1049_v46, %v1049_v46  ;;  %v324_v26 = vld [vmem:[#allocation2 + $0x68] sm:$0xff]  ;;  %v341_v46 = vld [vmem:[#allocation2 + $0xf0] sm:$0xff] }
 0x156   : > { %v1448_v52 = vpack.c.bf16 %v1034_v47, %v1034_v47  ;;  %v1050_v53 = vsel %vm986_vm2, %v954_v27, %v1018_v38  ;;  %v939_v54 = vadd.f32 %v2054_v15, %v900_v48  ;;  %v916_v55 = vld [vmem:[#allocation2 + $0xc0] sm:$0xff]  ;;  %v834_v58 = vadd.f32 %v1521_v40, %v321_v39  ;;  %v340_v27 = vld [vmem:[#allocation2 + $0xe8] sm:$0xff] }
 0x157   : > { %1194 = vst.msk [vmem:[%s2068_s29 + $0x18] sm:$0xf] %vm1187_vm3, %v1447_v45  ;;  %v1464_v56 = vpack.c.bf16 %v1050_v53, %v1050_v53  ;;  %v955_v57 = vadd.f32 %v2054_v15, %v916_v55  ;;  %v850_v59 = vadd.f32 %v1569_v42, %v337_v41  ;;  %1210 = vst.msk [vmem:[%s2068_s29 + $0x58] sm:$0xf] %vm1187_vm3, %v1463_v51  ;;  %v1525_v2 = vpop.f32.mrb[24].mxu0  ;;  %v1573_v3 = vpop.f32.mrb[24].mxu1 }
 0x158   : > { %1195 = vst.msk [vmem:[%s2068_s29 + $0x1c] sm:$0xf] %vm1187_vm3, %v1448_v52  ;;  %vm971_vm4 = vcmp.gt.f32.partialorder %v939_v54, 0.0  ;;  %v1003_v62 = vmul.f32 0.2, %v939_v54  ;;  %v901_v63 = vld [vmem:[#allocation2 + $0x48] sm:$0xff]  ;;  %v835_v0 = vadd.f32 %v1524_v50, %v322_v49  ;;  %v1572_v1 = vadd.f32 %v1571_v44, %v1570_v34 }
 0x159   : > { %1211 = vst.msk [vmem:[%s2068_s29 + $0x5c] sm:$0xf] %vm1187_vm3, %v1464_v56  ;;  %vm987_vm5 = vcmp.gt.f32.partialorder %v955_v57, 0.0  ;;  %v1019_v4 = vmul.f32 0.2, %v955_v57  ;;  %v940_v5 = vadd.f32 %v2054_v15, %v901_v63  ;;  %v1526_v6 = vpop.f32.mrb[25].mxu0 }
 0x15a   : > { %867 = vst.msk [vmem:[#allocation2 + $0x50] sm:$0xff] %vm278_vm0, %v834_v58  ;;  %883 = vst.msk [vmem:[#allocation2 + $0xd0] sm:$0xff] %vm278_vm0, %v850_v59  ;;  %v1574_v8 = vpop.f32.mrb[25].mxu1  ;;  %v1035_v9 = vsel %vm971_vm4, %v939_v54, %v1003_v62  ;;  %v917_v10 = vld [vmem:[#allocation2 + $0xc8] sm:$0xff]  ;;  %v851_v11 = vadd.f32 %v1572_v1, %v338_v60  ;;  %v1527_v12 = vadd.f32 %v1526_v6, %v1525_v2  ;;  %v1528_v14 = vpop.f32.mrb[26].mxu0  ;;  %v325_v44 = vld [vmem:[#allocation2 + $0x70] sm:$0xff] }
 0x15b   : > { %868 = vst.msk [vmem:[#allocation2 + $0x58] sm:$0xff] %vm278_vm0, %v835_v0  ;;  %v1575_v13 = vadd.f32 %v1574_v8, %v1573_v3  ;;  %v1576_v16 = vpop.f32.mrb[26].mxu1  ;;  %v1449_v17 = vpack.c.bf16 %v1035_v9, %v1035_v9  ;;  %v1051_v18 = vsel %vm987_vm5, %v955_v57, %v1019_v4  ;;  %vm972_vm6 = vcmp.gt.f32.partialorder %v940_v5, 0.0  ;;  %v1529_v20 = vpop.f32.mrb[27].mxu0  ;;  %v326_v2 = vld [vmem:[#allocation2 + $0x78] sm:$0xff] }
 0x15c   : > { %v1004_v19 = vmul.f32 0.2, %v940_v5  ;;  %v1577_v21 = vpop.f32.mrb[27].mxu1  ;;  %v1465_v22 = vpack.c.bf16 %v1051_v18, %v1051_v18  ;;  %v956_v23 = vadd.f32 %v2054_v15, %v917_v10  ;;  %884 = vst.msk [vmem:[#allocation2 + $0xd8] sm:$0xff] %vm278_vm0, %v851_v11  ;;  %v836_v24 = vadd.f32 %v1527_v12, %v323_v61  ;;  %v342_v11 = vld [vmem:[#allocation2 + $0xf8] sm:$0xff] }
 0x15d   : > { %v852_v25 = vadd.f32 %v1575_v13, %v339_v7  ;;  %1196 = vst.msk [vmem:[%s2068_s29 + $0x20] sm:$0xf] %vm1187_vm3, %v1449_v17  ;;  %v1530_v29 = vadd.f32 %v1529_v20, %v1528_v14  ;;  %v1578_v30 = vadd.f32 %v1577_v21, %v1576_v16 }
 0x15e   : > { %v1036_v28 = vsel %vm972_vm6, %v940_v5, %v1004_v19  ;;  %1212 = vst.msk [vmem:[%s2068_s29 + $0x60] sm:$0xf] %vm1187_vm3, %v1465_v22  ;;  %vm988_vm7 = vcmp.gt.f32.partialorder %v956_v23, 0.0  ;;  %v1020_v32 = vmul.f32 0.2, %v956_v23 }
 0x15f   : > { %v1450_v31 = vpack.c.bf16 %v1036_v28, %v1036_v28  ;;  %869 = vst.msk [vmem:[#allocation2 + $0x60] sm:$0xff] %vm278_vm0, %v836_v24  ;;  %885 = vst.msk [vmem:[#allocation2 + $0xe0] sm:$0xff] %vm278_vm0, %v852_v25  ;;  %v837_v33 = vadd.f32 %v1530_v29, %v324_v26  ;;  %v853_v34 = vadd.f32 %v1578_v30, %v340_v27  ;;  %v1531_v38 = vpop.f32.mrb[28].mxu0  ;;  %v1579_v39 = vpop.f32.mrb[28].mxu1 }
 0x160   : > { %v1052_v35 = vsel %vm988_vm7, %v956_v23, %v1020_v32  ;;  %v1532_v45 = vpop.f32.mrb[29].mxu0  ;;  %v1580_v47 = vpop.f32.mrb[29].mxu1 }
 0x161   : > { %1197 = vst.msk [vmem:[%s2068_s29 + $0x24] sm:$0xf] %vm1187_vm3, %v1450_v31  ;;  %v902_v36 = vld [vmem:[#allocation2 + $0x50] sm:$0xff]  ;;  %v1466_v40 = vpack.c.bf16 %v1052_v35, %v1052_v35  ;;  %v1533_v49 = vadd.f32 %v1532_v45, %v1531_v38  ;;  %v1581_v50 = vadd.f32 %v1580_v47, %v1579_v39  ;;  %v1534_v51 = vpop.f32.mrb[30].mxu0  ;;  %v1582_v52 = vpop.f32.mrb[30].mxu1 }
 0x162   : > { %v918_v37 = vld [vmem:[#allocation2 + $0xd0] sm:$0xff]  ;;  %v941_v41 = vadd.f32 %v2054_v15, %v902_v36  ;;  %v903_v43 = vld [vmem:[#allocation2 + $0x58] sm:$0xff]  ;;  %870 = vst.msk [vmem:[#allocation2 + $0x68] sm:$0xff] %vm278_vm0, %v837_v33  ;;  %886 = vst.msk [vmem:[#allocation2 + $0xe8] sm:$0xff] %vm278_vm0, %v853_v34  ;;  %v1535_v59 = vpop.f32.mrb[31].mxu0  ;;  %v1583_v60 = vpop.f32.mrb[31].mxu1 }
 0x163   : > { %v957_v42 = vadd.f32 %v2054_v15, %v918_v37  ;;  %v942_v48 = vadd.f32 %v2054_v15, %v903_v43  ;;  %1213 = vst.msk [vmem:[%s2068_s29 + $0x64] sm:$0xf] %vm1187_vm3, %v1466_v40  ;;  %v919_v56 = vld [vmem:[#allocation2 + $0xd8] sm:$0xff]  ;;  %v838_v57 = vadd.f32 %v1533_v49, %v325_v44  ;;  %v854_v58 = vadd.f32 %v1581_v50, %v341_v46 }
 0x164   : > { %vm973_vm8 = vcmp.gt.f32.partialorder %v941_v41, 0.0  ;;  %v1005_v53 = vmul.f32 0.2, %v941_v41  ;;  %v958_v63 = vadd.f32 %v2054_v15, %v919_v56  ;;  %v1536_v3 = vadd.f32 %v1535_v59, %v1534_v51 }
 0x165   : > { %vm989_vm9 = vcmp.gt.f32.partialorder %v957_v42, 0.0  ;;  %v1021_v54 = vmul.f32 0.2, %v957_v42  ;;  %vm974_vm10 = vcmp.gt.f32.partialorder %v942_v48, 0.0  ;;  %v1006_v55 = vmul.f32 0.2, %v942_v48 }
 0x166   : > { %v1037_v61 = vsel %vm973_vm8, %v941_v41, %v1005_v53  ;;  %v904_v0 = vld [vmem:[#allocation2 + $0x60] sm:$0xff]  ;;  %871 = vst.msk [vmem:[#allocation2 + $0x70] sm:$0xff] %vm278_vm0, %v838_v57  ;;  %887 = vst.msk [vmem:[#allocation2 + $0xf0] sm:$0xff] %vm278_vm0, %v854_v58  ;;  %vm990_vm11 = vcmp.gt.f32.partialorder %v958_v63, 0.0  ;;  %v1022_v9 = vmul.f32 0.2, %v958_v63  ;;  %v839_v16 = vadd.f32 %v1536_v3, %v326_v2 }
 0x167   : > { %v1053_v62 = vsel %vm989_vm9, %v957_v42, %v1021_v54  ;;  %v920_v1 = vld [vmem:[#allocation2 + $0xe0] sm:$0xff]  ;;  %v1451_v4 = vpack.c.bf16 %v1037_v61, %v1037_v61  ;;  %v1038_v6 = vsel %vm974_vm10, %v942_v48, %v1006_v55  ;;  %v943_v7 = vadd.f32 %v2054_v15, %v904_v0 }
 0x168   : > { %v1467_v5 = vpack.c.bf16 %v1053_v62, %v1053_v62  ;;  %v1452_v8 = vpack.c.bf16 %v1038_v6, %v1038_v6  ;;  %v959_v10 = vadd.f32 %v2054_v15, %v920_v1  ;;  %v1584_v17 = vadd.f32 %v1583_v60, %v1582_v52  ;;  %872 = vst.msk [vmem:[#allocation2 + $0x78] sm:$0xff] %vm278_vm0, %v839_v16 }
 0x169   : > { %1198 = vst.msk [vmem:[%s2068_s29 + $0x28] sm:$0xf] %vm1187_vm3, %v1451_v4  ;;  %vm975_vm12 = vcmp.gt.f32.partialorder %v943_v7, 0.0  ;;  %v1007_v12 = vmul.f32 0.2, %v943_v7  ;;  %v905_v13 = vld [vmem:[#allocation2 + $0x68] sm:$0xff]  ;;  %v1054_v18 = vsel %vm990_vm11, %v958_v63, %v1022_v9 }
 0x16a   : > { %1214 = vst.msk [vmem:[%s2068_s29 + $0x68] sm:$0xf] %vm1187_vm3, %v1467_v5  ;;  %v921_v14 = vld [vmem:[#allocation2 + $0xe8] sm:$0xff]  ;;  %1199 = vst.msk [vmem:[%s2068_s29 + $0x2c] sm:$0xf] %vm1187_vm3, %v1452_v8  ;;  %vm991_vm13 = vcmp.gt.f32.partialorder %v959_v10, 0.0  ;;  %v944_v20 = vadd.f32 %v2054_v15, %v905_v13  ;;  %v1468_v21 = vpack.c.bf16 %v1054_v18, %v1054_v18  ;;  %v855_v24 = vadd.f32 %v1584_v17, %v342_v11 }
 0x16b   : > { %v1023_v19 = vmul.f32 0.2, %v959_v10  ;;  %v1039_v22 = vsel %vm975_vm12, %v943_v7, %v1007_v12  ;;  %v960_v23 = vadd.f32 %v2054_v15, %v921_v14 }
 0x16c   : > { %v1453_v25 = vpack.c.bf16 %v1039_v22, %v1039_v22  ;;  %vm976_vm14 = vcmp.gt.f32.partialorder %v944_v20, 0.0  ;;  %v1008_v27 = vmul.f32 0.2, %v944_v20  ;;  %1215 = vst.msk [vmem:[%s2068_s29 + $0x6c] sm:$0xf] %vm1187_vm3, %v1468_v21 }
 0x16d   : > { %v1055_v26 = vsel %vm991_vm13, %v959_v10, %v1023_v19  ;;  %vm992_vm15 = vcmp.gt.f32.partialorder %v960_v23, 0.0  ;;  %v1024_v29 = vmul.f32 0.2, %v960_v23  ;;  %888 = vst.msk [vmem:[#allocation2 + $0xf8] sm:$0xff] %vm278_vm0, %v855_v24  ;;  %v906_v31 = vld [vmem:[#allocation2 + $0x70] sm:$0xff] }
 0x16e   : > { %v1469_v28 = vpack.c.bf16 %v1055_v26, %v1055_v26  ;;  %1200 = vst.msk [vmem:[%s2068_s29 + $0x30] sm:$0xf] %vm1187_vm3, %v1453_v25  ;;  %v1040_v30 = vsel %vm976_vm14, %v944_v20, %v1008_v27  ;;  %v922_v32 = vld [vmem:[#allocation2 + $0xf0] sm:$0xff]  ;;  %v945_v35 = vadd.f32 %v2054_v15, %v906_v31 }
 0x16f   : > { %v1454_v33 = vpack.c.bf16 %v1040_v30, %v1040_v30  ;;  %v1056_v34 = vsel %vm992_vm15, %v960_v23, %v1024_v29  ;;  %v961_v36 = vadd.f32 %v2054_v15, %v922_v32  ;;  %v907_v40 = vld [vmem:[#allocation2 + $0x78] sm:$0xff] }
 0x170   : > { %1216 = vst.msk [vmem:[%s2068_s29 + $0x70] sm:$0xf] %vm1187_vm3, %v1469_v28  ;;  %v1470_v37 = vpack.c.bf16 %v1056_v34, %v1056_v34  ;;  %vm977_vm1 = vcmp.gt.f32.partialorder %v945_v35, 0.0  ;;  %v1009_v38 = vmul.f32 0.2, %v945_v35  ;;  %v946_v43 = vadd.f32 %v2054_v15, %v907_v40 }
 0x171   : > { %1201 = vst.msk [vmem:[%s2068_s29 + $0x34] sm:$0xf] %vm1187_vm3, %v1454_v33  ;;  %vm993_vm0 = vcmp.gt.f32.partialorder %v961_v36, 0.0  ;;  %v1025_v39 = vmul.f32 0.2, %v961_v36 }
 0x172   : > { %1217 = vst.msk [vmem:[%s2068_s29 + $0x74] sm:$0xf] %vm1187_vm3, %v1470_v37  ;;  %v1041_v41 = vsel %vm977_vm1, %v945_v35, %v1009_v38  ;;  %vm978_vm2 = vcmp.gt.f32.partialorder %v946_v43, 0.0  ;;  %v1010_v47 = vmul.f32 0.2, %v946_v43 }
 0x173   : > { %v1057_v42 = vsel %vm993_vm0, %v961_v36, %v1025_v39  ;;  %v1455_v44 = vpack.c.bf16 %v1041_v41, %v1041_v41 }
 0x174   : > { %v1471_v45 = vpack.c.bf16 %v1057_v42, %v1057_v42  ;;  %v923_v46 = vld [vmem:[#allocation2 + $0xf8] sm:$0xff]  ;;  %v1042_v49 = vsel %vm978_vm2, %v946_v43, %v1010_v47 }
 0x175   : > { %v962_v48 = vadd.f32 %v2054_v15, %v923_v46  ;;  %1202 = vst.msk [vmem:[%s2068_s29 + $0x38] sm:$0xf] %vm1187_vm3, %v1455_v44  ;;  %v1456_v51 = vpack.c.bf16 %v1042_v49, %v1042_v49 }
 0x176   : > { %1218 = vst.msk [vmem:[%s2068_s29 + $0x78] sm:$0xf] %vm1187_vm3, %v1471_v45 }
 0x177   : > { %vm994_vm4 = vcmp.gt.f32.partialorder %v962_v48, 0.0  ;;  %v1026_v50 = vmul.f32 0.2, %v962_v48  ;;  %1203 = vst.msk [vmem:[%s2068_s29 + $0x3c] sm:$0xf] %vm1187_vm3, %v1456_v51 }
 0x179   : > { %v1058_v52 = vsel %vm994_vm4, %v962_v48, %v1026_v50 }
 0x17a   : > { %v1472_v53 = vpack.c.bf16 %v1058_v52, %v1058_v52 }
 0x17c   : > { %1219 = vst.msk [vmem:[%s2068_s29 + $0x7c] sm:$0xf] %vm1187_vm3, %v1472_v53 }
 0x17d PF: > { %s16_s17 = sadd.s32 1, %s1803_s17   ;;  %s2217_s12 = smov %s1787_s13 }
 0x17e   : > { %p13_p9 = scmp.ge.s32.totalorder %s16_s17, 10   ;;  %s2218_s13 = smov %s1791_s14 }
 0x17f   : > { %s2219_s14 = smov %s1878_s24  ;;  %s2220_s15 = smov %s1799_s16 }
 0x180   : > { %s2221_s16 = smov %s2223_s19  ;;  %15 = sbr.rel (!%p13_p9) target bundleno = 4 (0x4), region = 86 }
 0x187   :  { %1248 = vsyncpa [#allocation4], 1 }
 0x188   :  { %1250 = vsyncpa [#allocation4 + $0x1], 1 }

</bundles_post_ra>
